<compile_context>
chip_gen: v7x
topology: tpu7x:2x2x1
jax: 0.10.0
libtpu: 0.0.40
codegen_flags: <defaults>
</compile_context>

<pallas_src>
import jax
import jax.numpy as jnp
import numpy as np
from jax import lax
from jax.experimental import pallas as pl
from jax.experimental.pallas import tpu as pltpu

# ---------------------------------------------------------------------------
# Model configuration (small, deterministic)
# ---------------------------------------------------------------------------
LATENT_DIM = 8
Y_DIM = 4
HIDDEN_DIM = 32
OUTPUT_DIM = 16
HIDDEN_LAYERS = 2
ACT_TYPE = "ReLU"   # forward uses getattr(nn, act_type)(**act_args)
ACT_ARGS = {}

DIMS = np.linspace(LATENT_DIM + Y_DIM, HIDDEN_DIM, HIDDEN_LAYERS + 1, dtype=int)
# DIMS == [12, 22, 32]
LAYER_DIMS = [(int(a), int(b)) for a, b in zip(DIMS[:-1], DIMS[1:])] + [
    (HIDDEN_DIM, OUTPUT_DIM)
]
NUM_LAYERS = len(LAYER_DIMS)        # 3 linear layers total
D_IN = int(DIMS[0])                 # 12 = latent_dim + y_dim

PAD = 128                           # lane width; feature dims padded to this
ONES_LANE = PAD - 1                 # lane carrying constant 1.0 (bias fold)
MAX_BM = 2048                       # batch-tile cap (raised from 512)
MIN_SPLIT = 256                     # split into >=2 grid steps only if batch >= 2*MIN_SPLIT
SUBLANE = 16                        # bf16 sublane packing quantum

BATCH = 16

# The bias fold via a constant-one lane is only valid for act(1) == 1 (ReLU).
assert ACT_TYPE == "ReLU", "ones-lane bias fold requires act(1) == 1 (ReLU only)"
# Bias-fold requires the real feature widths to stay clear of the ones-lane.
assert all(d_in < ONES_LANE and d_out < ONES_LANE for d_in, d_out in LAYER_DIMS)


# ---------------------------------------------------------------------------
# Pallas kernel: fused 3-layer MLP (bf16 matmul chain, f32 accumulation,
# biases folded into weights via a constant-one lane built in VMEM)
# ---------------------------------------------------------------------------
def decoder_kernel(x_ref, w_ref, o_ref, h_ref):
    # x_ref: (bm, D_IN)  bf16  -- only the 12 real input lanes come from HBM
    # w_ref: (NUM_LAYERS, 128, 128) bf16 -- bias in row ONES_LANE of each layer
    # o_ref: (bm, 128)   bf16
    # h_ref: (bm, 128)   bf16 VMEM scratch: padded activation tile
    lane = lax.broadcasted_iota(jnp.int32, h_ref.shape, 1)
    # zeros everywhere, 1.0 in the ones-lane (single VPU select on loaded data)
    h_ref[...] = (lane == ONES_LANE).astype(h_ref.dtype)
    # place the 12 real input lanes (VMEM-local masked store, cheap)
    h_ref[:, :D_IN] = x_ref[...]
    h = h_ref[...]

    # Hidden layers: Linear (+ folded bias) + ReLU.
    # ReLU(1) == 1, so the constant-one lane is carried through exactly.
    for li in range(NUM_LAYERS - 1):
        h = jnp.maximum(
            jnp.dot(h, w_ref[li], preferred_element_type=jnp.float32), 0.0
        ).astype(h_ref.dtype)

    # Output layer: Linear (+ folded bias), no activation.
    o_ref[...] = jnp.dot(
        h, w_ref[NUM_LAYERS - 1], preferred_element_type=jnp.float32
    ).astype(o_ref.dtype)


def _cdiv(a, b):
    return -(-a // b)


def _round_up(n, m):
    return _cdiv(n, m) * m


def decoder_forward(x, w_packed):
    """x: (batch, latent_dim + y_dim) float; w_packed: (NUM_LAYERS, 128, 128) bf16."""
    batch, d_in = x.shape
    assert d_in == D_IN

    # Pick the tile count/size to minimize batch padding; for large batches
    # guarantee >= 2 grid steps so both v7x TensorCores get work.
    n_tiles = _cdiv(batch, MAX_BM)
    if n_tiles == 1 and batch >= 2 * MIN_SPLIT:
        n_tiles = 2
    bm = _round_up(_cdiv(batch, n_tiles), SUBLANE)   # bf16 sublane-aligned tile
    batch_pad = n_tiles * bm                         # no silently dropped rows

    x_bf = x.astype(jnp.bfloat16)
    if batch_pad != batch:
        x_bf = jnp.pad(x_bf, ((0, batch_pad - batch), (0, 0)))

    out = pl.pallas_call(
        decoder_kernel,
        out_shape=jax.ShapeDtypeStruct((batch_pad, PAD), jnp.bfloat16),
        grid=(n_tiles,),
        in_specs=[
            # narrow (12-lane) HBM input; last block dim == full array dim
            pl.BlockSpec((bm, D_IN), lambda i: (i, 0)),
            # single packed parameter slab, constant index_map across the grid
            pl.BlockSpec((NUM_LAYERS, PAD, PAD), lambda i: (0, 0, 0)),
        ],
        out_specs=pl.BlockSpec((bm, PAD), lambda i: (i, 0)),
        scratch_shapes=[pltpu.VMEM((bm, PAD), jnp.bfloat16)],
        compiler_params=pltpu.CompilerParams(
            dimension_semantics=("parallel",),
        ),
        cost_estimate=pl.CostEstimate(
            flops=2 * batch_pad * PAD * PAD * NUM_LAYERS,
            transcendentals=0,
            bytes_accessed=2
            * (batch_pad * D_IN + NUM_LAYERS * PAD * PAD + batch_pad * PAD),
        ),
    )(x_bf, w_packed)

    # Strip batch padding and the padded output lanes.
    # NOTE: padded rows contain bias-only values (ones-lane), never reuse them.
    return out[:batch, :OUTPUT_DIM].astype(jnp.float32)


# ---------------------------------------------------------------------------
# Deterministic parameter init (nn.Linear-like shapes) + packing
# ---------------------------------------------------------------------------
def init_params(key):
    params = []
    for d_in, d_out in LAYER_DIMS:
        key, kw, kb = jax.random.split(key, 3)
        bound = 1.0 / np.sqrt(d_in)
        # Stored as (in, out); PyTorch stores (out, in) and computes x @ W.T.
        w = jax.random.uniform(kw, (d_in, d_out), jnp.float32, -bound, bound)
        b = jax.random.uniform(kb, (d_out,), jnp.float32, -bound, bound)
        params.append((w, b))
    return params


def pack_params(params):
    """Pack all weights+biases into one zero-padded bf16 (NUM_LAYERS,128,128) slab."""
    slab = np.zeros((NUM_LAYERS, PAD, PAD), np.float32)
    for li, (w, b) in enumerate(params):
        d_in, d_out = w.shape
        slab[li, :d_in, :d_out] = np.asarray(w)
        slab[li, ONES_LANE, :d_out] = np.asarray(b)        # bias row (folded)
        if li < NUM_LAYERS - 1:
            slab[li, ONES_LANE, ONES_LANE] = 1.0           # carry the ones-lane
    return jnp.asarray(slab, dtype=jnp.bfloat16)


def decoder_reference(x, params):
    h = x
    for li, (w, b) in enumerate(params):
        h = h @ w + b
        if li < NUM_LAYERS - 1:
            h = jnp.maximum(h, 0.0)
    return h


if __name__ == "__main__":
    key = jax.random.PRNGKey(0)
    key, kx = jax.random.split(key)
    x = jax.random.normal(kx, (BATCH, D_IN), jnp.float32)
    params = init_params(key)
    w_packed = pack_params(params)

    out = decoder_forward(x, w_packed)
    out = jax.block_until_ready(out)

    ref = decoder_reference(x, params)
    # bf16 weights/activations with f32 accumulation: loosen tolerance vs f32.
    np.testing.assert_allclose(np.asarray(out), np.asarray(ref), rtol=2e-2, atol=2e-2)

    print("KERNEL_OK")
</pallas_src>

<mosaic_0001>
module attributes {stable_mosaic.version = 11 : i64} {
  func.func @decoder_kernel(%arg0: i32, %arg1: memref<16x12xbf16, #tpu.memory_space<vmem>>, %arg2: memref<3x128x128xbf16, #tpu.memory_space<vmem>>, %arg3: memref<16x128xbf16, #tpu.memory_space<vmem>>, %arg4: memref<16x128xbf16, #tpu.memory_space<vmem>>) attributes {dimension_semantics = [#tpu.dimension_semantics<parallel>], iteration_bounds = array<i64: 1>, scalar_prefetch = 0 : i64, scratch_operands = 1 : i64, tpu.core_type = #tpu.core_type<tc>, window_params = [{transform_indices = @transform_0, window_bounds = array<i64: 16, 12>}, {pipeline_mode = #tpu.pipeline_mode<synchronous>, transform_indices = @transform_1, window_bounds = array<i64: 3, 128, 128>}, {transform_indices = @transform_2, window_bounds = array<i64: 16, 128>}]} {
    %0 = tpu.iota {dimensions = array<i32: 1>} : vector<16x128xi32>
    %c127_i32 = arith.constant 127 : i32
    %1 = vector.broadcast %c127_i32 : i32 to vector<16x128xi32>
    %2 = arith.cmpi eq, %0, %1 : vector<16x128xi32>
    %3 = arith.extui %2 : vector<16x128xi1> to vector<16x128xi32>
    %4 = arith.sitofp %3 : vector<16x128xi32> to vector<16x128xf32>
    %5 = arith.truncf %4 : vector<16x128xf32> to vector<16x128xbf16>
    %c0 = arith.constant 0 : index
    %c0_0 = arith.constant 0 : index
    %6 = vector.load %arg4[%c0, %c0_0] : memref<16x128xbf16, #tpu.memory_space<vmem>>, vector<16x128xbf16>
    tpu.vector_store %arg4[%c0, %c0_0], %5 {strides = array<i32>} : memref<16x128xbf16, #tpu.memory_space<vmem>>, vector<16x128xbf16>,
    %c0_1 = arith.constant 0 : index
    %c0_2 = arith.constant 0 : index
    %7 = vector.load %arg1[%c0_1, %c0_2] : memref<16x12xbf16, #tpu.memory_space<vmem>>, vector<16x12xbf16>
    %c0_3 = arith.constant 0 : index
    %c0_4 = arith.constant 0 : index
    %8 = vector.load %arg4[%c0_3, %c0_4] : memref<16x128xbf16, #tpu.memory_space<vmem>>, vector<16x12xbf16>
    tpu.vector_store %arg4[%c0_3, %c0_4], %7 {strides = array<i32>} : memref<16x128xbf16, #tpu.memory_space<vmem>>, vector<16x12xbf16>,
    %c0_5 = arith.constant 0 : index
    %c0_6 = arith.constant 0 : index
    %9 = vector.load %arg4[%c0_5, %c0_6] : memref<16x128xbf16, #tpu.memory_space<vmem>>, vector<16x128xbf16>
    %c0_7 = arith.constant 0 : index
    %c0_8 = arith.constant 0 : index
    %c0_9 = arith.constant 0 : index
    %10 = vector.load %arg2[%c0_7, %c0_8, %c0_9] : memref<3x128x128xbf16, #tpu.memory_space<vmem>>, vector<1x128x128xbf16>
    %11 = vector.shape_cast %10 : vector<1x128x128xbf16> to vector<128x128xbf16>
    %cst = arith.constant dense<0.000000e+00> : vector<16x128xf32>
    %12 = tpu.matmul %9, %11, %cst {dimension_numbers = #tpu.dot_dimension_numbers<[1], [0], [0], [1], [0, 0, 1, 1], [], []>} : vector<16x128xbf16>, vector<128x128xbf16>, vector<16x128xf32> -> vector<16x128xf32>
    %cst_10 = arith.constant 0.000000e+00 : f32
    %13 = vector.broadcast %cst_10 : f32 to vector<16x128xf32>
    %14 = arith.maximumf %12, %13 : vector<16x128xf32>
    %15 = arith.truncf %14 : vector<16x128xf32> to vector<16x128xbf16>
    %c1 = arith.constant 1 : index
    %c0_11 = arith.constant 0 : index
    %c0_12 = arith.constant 0 : index
    %16 = vector.load %arg2[%c1, %c0_11, %c0_12] : memref<3x128x128xbf16, #tpu.memory_space<vmem>>, vector<1x128x128xbf16>
    %17 = vector.shape_cast %16 : vector<1x128x128xbf16> to vector<128x128xbf16>
    %cst_13 = arith.constant dense<0.000000e+00> : vector<16x128xf32>
    %18 = tpu.matmul %15, %17, %cst_13 {dimension_numbers = #tpu.dot_dimension_numbers<[1], [0], [0], [1], [0, 0, 1, 1], [], []>} : vector<16x128xbf16>, vector<128x128xbf16>, vector<16x128xf32> -> vector<16x128xf32>
    %cst_14 = arith.constant 0.000000e+00 : f32
    %19 = vector.broadcast %cst_14 : f32 to vector<16x128xf32>
    %20 = arith.maximumf %18, %19 : vector<16x128xf32>
    %21 = arith.truncf %20 : vector<16x128xf32> to vector<16x128xbf16>
    %c2 = arith.constant 2 : index
    %c0_15 = arith.constant 0 : index
    %c0_16 = arith.constant 0 : index
    %22 = vector.load %arg2[%c2, %c0_15, %c0_16] : memref<3x128x128xbf16, #tpu.memory_space<vmem>>, vector<1x128x128xbf16>
    %23 = vector.shape_cast %22 : vector<1x128x128xbf16> to vector<128x128xbf16>
    %cst_17 = arith.constant dense<0.000000e+00> : vector<16x128xf32>
    %24 = tpu.matmul %21, %23, %cst_17 {dimension_numbers = #tpu.dot_dimension_numbers<[1], [0], [0], [1], [0, 0, 1, 1], [], []>} : vector<16x128xbf16>, vector<128x128xbf16>, vector<16x128xf32> -> vector<16x128xf32>
    %25 = arith.truncf %24 : vector<16x128xf32> to vector<16x128xbf16>
    %c0_18 = arith.constant 0 : index
    %c0_19 = arith.constant 0 : index
    %26 = vector.load %arg3[%c0_18, %c0_19] : memref<16x128xbf16, #tpu.memory_space<vmem>>, vector<16x128xbf16>
    tpu.vector_store %arg3[%c0_18, %c0_19], %25 {strides = array<i32>} : memref<16x128xbf16, #tpu.memory_space<vmem>>, vector<16x128xbf16>,
    return
  }
  func.func @transform_0(%arg0: i32) -> (i32, i32) {
    %c0_i32 = arith.constant 0 : i32
    %c0_i32_0 = arith.constant 0 : i32
    return %arg0, %c0_i32 : i32, i32
  }
  func.func @transform_1(%arg0: i32) -> (i32, i32, i32) {
    %c0_i32 = arith.constant 0 : i32
    %c0_i32_0 = arith.constant 0 : i32
    %c0_i32_1 = arith.constant 0 : i32
    %c0_i32_2 = arith.constant 0 : i32
    return %c0_i32, %c0_i32_0, %c0_i32_1 : i32, i32, i32
  }
  func.func @transform_2(%arg0: i32) -> (i32, i32) {
    %c0_i32 = arith.constant 0 : i32
    %c0_i32_0 = arith.constant 0 : i32
    return %arg0, %c0_i32 : i32, i32
  }
}

</mosaic_0001>

<bundles_post_ra>
// kernel: tpu_custom_call.1
= control target key start
LH: loop header
LB: loop body
LE: loop exit
PB: predicated region body
PF: predicated region fallthrough
CT: control target
= control target key end

     0   :  { %7 = vsyncpa [#allocation4], 0  ;;  %s734_s0 = inlined_call_operand.hbm [shape: bf16[16,12], index: 0, kind: input, shape index: {}]   ;;  %s735_s1 = inlined_call_operand.hbm [shape: bf16[3,128,128], index: 1, kind: input, shape index: {}]   ;;  %s736_s2 = inlined_call_operand.hbm [shape: bf16[16,128], index: 2, kind: output, shape index: {}]  }
   0x1   :  { %8 = vsyncpa [#allocation7], 0 }
   0x2   :  { %9 = vsyncpa [#allocation5], 0  ;;  %s636_s9 = smov [#allocation3]   ;;  %s564_s13 = scalar_lea.hbm %s734_s0, 128 }
   0x3   :  { %s15_s10 = sshll.u32 %s636_s9, 4  ;;  %p565_p0 = scmp.ne.s32.totalorder %s734_s0, %s564_s13  ;;  %s16_s10 = int_to_ptr.vmem [resolvable:$true] %s15_s10 }
   0x4   :  { %p568_p1 = scmp.lt.u32.totalorder %s564_s13, %s734_s0 }
   0x6   :  { %p570_p2 = pnand %p568_p1, %p565_p0 }
   0x8   :  { %573 = shalt.err (!%p570_p2)
}
   0x9   :  { %s574_s18 = scalar_lea.vmem %s16_s10, 128  ;;  %p579_p4 = scmp.lt.s32.totalorder %s16_s10, %s16_s10 }
   0xa   :  { %p575_p3 = scmp.ne.s32.totalorder %s16_s10, %s574_s18  ;;  %p580_p5 = scmp.lt.s32.totalorder %s574_s18, %s574_s18 }
   0xc   :  { %p581_p6 = por %p580_p5, %p579_p4 }
   0xe   :  { %p582_p7 = pnand %p581_p6, %p575_p3 }
  0x10   :  { %585 = shalt.err (!%p582_p7)
}
  0x11   :  { %s637_s19 = smov 64   ;;  %s638_s20 = smov 4  }
  0x12   :  { %21 = dma.hbm_to_vmem [thread:$0]  %s734_s0, 128, %s16_s10, [#allocation4], %s637_s19, %s637_s19, %s638_s20  }
  0x13   :  { %s639_s23 = smov [#allocation6]   ;;  %s586_s27 = scalar_lea.hbm %s735_s1, 3072 }
  0x14   :  { %s27_s24 = sshll.u32 %s639_s23, 4  ;;  %p587_p8 = scmp.ne.s32.totalorder %s735_s1, %s586_s27  ;;  %s28_s24 = int_to_ptr.vmem [resolvable:$true] %s27_s24 }
  0x15   :  { %p590_p9 = scmp.lt.u32.totalorder %s586_s27, %s735_s1 }
  0x17   :  { %p592_p10 = pnand %p590_p9, %p587_p8 }
  0x19   :  { %595 = shalt.err (!%p592_p10)
}
  0x1a   :  { %s596_s4 = scalar_lea.vmem %s28_s24, 3072  ;;  %p601_p12 = scmp.lt.s32.totalorder %s28_s24, %s28_s24 }
  0x1b   :  { %p597_p11 = scmp.ne.s32.totalorder %s28_s24, %s596_s4  ;;  %p602_p13 = scmp.lt.s32.totalorder %s596_s4, %s596_s4 }
  0x1d   :  { %p603_p0 = por %p602_p13, %p601_p12 }
  0x1f   :  { %p604_p1 = pnand %p603_p0, %p597_p11 }
  0x21   :  { %607 = shalt.err (!%p604_p1)
}
  0x22   :  { %33 = dma.hbm_to_vmem [thread:$0]  %s735_s1, 3072, %s28_s24, [#allocation7], %s637_s19, %s637_s19, %s638_s20  }
  0x23   :  { %630 = dma.done.wait [#allocation4], 128  }
  0x24   :  { %631 = vsyncadd [#allocation4], 4294967168 }
  0x25   :  { %632 = dma.done.wait [#allocation7], 3072  }
  0x26   :  { %633 = vsyncadd [#allocation7], 4294964224  ;;  %v41_v0 = vlaneseq  ;;  %v640_v1 = vmov 0.0   ;;  %vm641_vm0 = vmmov 0   ;;  %v539_v5 = vld [vmem:[#allocation6] sm:$0xff]   ;;  %v540_v6 = vld [vmem:[#allocation6 + $0x8] sm:$0xff]  }
  0x27   :  { %472 = vmatprep.subr.bf16.mxu0 %v640_v1  ;;  %488 = vmatprep.mubr.msk.bf16.mxu0 %vm641_vm0, %v640_v1  ;;  %v541_v7 = vld [vmem:[#allocation6 + $0x10] sm:$0xff]   ;;  %vm56_vm2 = vcmask 97280   ;;  %v547_v8 = vld [vmem:[#allocation3] sm:$0xff]   ;;  %v548_v9 = vld [vmem:[#allocation6 + $0x40] sm:$0xff]   ;;  %s642_s1 = smov [#allocation8]  }
  0x28   :  { %v42_v2 = vand.u32 127, %v41_v0  ;;  %492 = vmatprep.subr.bf16.mxu1 %v640_v1  ;;  %508 = vmatprep.mubr.msk.bf16.mxu1 %vm641_vm0, %v640_v1  ;;  %v542_v10 = vld [vmem:[#allocation6 + $0x18] sm:$0xff]   ;;  %v549_v11 = vld [vmem:[#allocation6 + $0x48] sm:$0xff]   ;;  %v543_v12 = vld [vmem:[#allocation6 + $0x20] sm:$0xff]   ;;  %s397_s6 = sshll.u32 %s642_s1, 4  ;;  %s398_s6 = int_to_ptr.vmem [resolvable:$true] %s397_s6 }
  0x29   :  { %473 = vmatpush3.bf16.msra.mxu0 %v539_v5  ;;  %493 = vmatpush3.bf16.msra.mxu1 %v548_v9  ;;  %v550_v13 = vld [vmem:[#allocation6 + $0x50] sm:$0xff]   ;;  %v544_v14 = vld [vmem:[#allocation6 + $0x28] sm:$0xff]   ;;  %v551_v15 = vld [vmem:[#allocation6 + $0x58] sm:$0xff]   ;;  %s608_s7 = scalar_lea.vmem %s398_s6, 128  ;;  %p613_p3 = scmp.lt.s32.totalorder %s398_s6, %s398_s6 }
  0x2a   :  { %vm43_vm1 = vcmp.eq.s32.totalorder %v42_v2, 127  ;;  %474 = vmatprep.subr.bf16.mxu0 %v640_v1  ;;  %494 = vmatprep.subr.bf16.mxu1 %v640_v1  ;;  %v545_v16 = vld [vmem:[#allocation6 + $0x30] sm:$0xff]   ;;  %v552_v17 = vld [vmem:[#allocation6 + $0x60] sm:$0xff]   ;;  %v546_v18 = vld [vmem:[#allocation6 + $0x38] sm:$0xff]   ;;  %p609_p2 = scmp.ne.s32.totalorder %s398_s6, %s608_s7  ;;  %p614_p4 = scmp.lt.s32.totalorder %s608_s7, %s608_s7 }
  0x2b   :  { %v410_v3 = vsel %vm43_vm1, 1.0, %v640_v1  ;;  %v553_v19 = vld [vmem:[#allocation6 + $0x68] sm:$0xff]   ;;  %v554_v21 = vld [vmem:[#allocation6 + $0x70] sm:$0xff]   ;;  %v555_v22 = vld [vmem:[#allocation6 + $0x78] sm:$0xff]  }
  0x2c   :  { %v46_v4 = vpack.c.bf16 %v410_v3, %v410_v3  ;;  %v556_v23 = vld [vmem:[#allocation6 + $0x80] sm:$0xff]   ;;  %v557_v24 = vld [vmem:[#allocation6 + $0x88] sm:$0xff]   ;;  %v558_v25 = vld [vmem:[#allocation6 + $0x90] sm:$0xff]   ;;  %p615_p5 = por %p614_p4, %p613_p3 }
  0x2d   :  { %475 = vmatpush3.bf16.msra.mxu0 %v540_v6  ;;  %495 = vmatpush3.bf16.msra.mxu1 %v549_v11  ;;  %v559_v26 = vld [vmem:[#allocation6 + $0x98] sm:$0xff]   ;;  %v560_v27 = vld [vmem:[#allocation6 + $0xa0] sm:$0xff]   ;;  %v561_v28 = vld [vmem:[#allocation6 + $0xa8] sm:$0xff]  }
  0x2e   :  { %47 = vst [vmem:[#allocation2] sm:$0xff] %v46_v4  ;;  %476 = vmatprep.subr.bf16.mxu0 %v640_v1  ;;  %496 = vmatprep.subr.bf16.mxu1 %v640_v1  ;;  %v562_v36 = vld [vmem:[#allocation6 + $0xb0] sm:$0xff]   ;;  %v563_v37 = vld [vmem:[#allocation6 + $0xb8] sm:$0xff]   ;;  %p616_p6 = pnand %p615_p5, %p609_p2 }
  0x2f   :  { %57 = vst.msk [vmem:[#allocation2] sm:$0xff] %vm56_vm2, %v547_v8 }
  0x31   :  { %477 = vmatpush3.bf16.msra.mxu0 %v541_v7  ;;  %497 = vmatpush3.bf16.msra.mxu1 %v550_v13 }
  0x32   :  { %478 = vmatprep.subr.bf16.mxu0 %v640_v1  ;;  %498 = vmatprep.subr.bf16.mxu1 %v640_v1 }
  0x35   :  { %479 = vmatpush3.bf16.msra.mxu0 %v542_v10  ;;  %499 = vmatpush3.bf16.msra.mxu1 %v551_v15 }
  0x36   :  { %480 = vmatprep.subr.bf16.mxu0 %v640_v1  ;;  %500 = vmatprep.subr.bf16.mxu1 %v640_v1  ;;  %v58_v20 = vld [vmem:[#allocation2] sm:$0xff] }
  0x39   :  { %481 = vmatpush3.bf16.msra.mxu0 %v543_v12  ;;  %501 = vmatpush3.bf16.msra.mxu1 %v552_v17 }
  0x3a   :  { %482 = vmatprep.subr.bf16.mxu0 %v640_v1  ;;  %502 = vmatprep.subr.bf16.mxu1 %v640_v1 }
  0x3d   :  { %483 = vmatpush3.bf16.msra.mxu0 %v544_v14  ;;  %503 = vmatpush3.bf16.msra.mxu1 %v553_v19 }
  0x3e   :  { %484 = vmatprep.subr.bf16.mxu0 %v640_v1  ;;  %504 = vmatprep.subr.bf16.mxu1 %v640_v1 }
  0x41   :  { %485 = vmatpush3.bf16.msra.mxu0 %v545_v16  ;;  %505 = vmatpush3.bf16.msra.mxu1 %v554_v21 }
  0x42   :  { %486 = vmatprep.subr.bf16.mxu0 %v640_v1  ;;  %506 = vmatprep.subr.bf16.mxu1 %v640_v1 }
  0x45   :  { %487 = vmatpush3.bf16.msra.mxu0 %v546_v18  ;;  %507 = vmatpush3.bf16.msra.mxu1 %v555_v22 }
  0x46   :  { %512 = vmatprep.subr.bf16.mxu0 %v640_v1 }
  0x48   :  { %489 = vmatmul.mubr.bf16.vlgmr.msra.gmra.mrb[0].mxu0 %v58_v20 }
  0x49   :  { %528 = vmatprep.mubr.msk.bf16.mxu0 %vm641_vm0, %v640_v1  ;;  %513 = vmatpush3.bf16.msra.mxu0 %v556_v23 }
  0x4a   :  { %514 = vmatprep.subr.bf16.mxu0 %v640_v1 }
  0x4d   :  { %515 = vmatpush3.bf16.msra.mxu0 %v557_v24 }
  0x4e   :  { %516 = vmatprep.subr.bf16.mxu0 %v640_v1 }
  0x51   :  { %517 = vmatpush3.bf16.msra.mxu0 %v558_v25 }
  0x52   :  { %518 = vmatprep.subr.bf16.mxu0 %v640_v1 }
  0x55   :  { %519 = vmatpush3.bf16.msra.mxu0 %v559_v26 }
  0x56   :  { %520 = vmatprep.subr.bf16.mxu0 %v640_v1 }
  0x59   :  { %521 = vmatpush3.bf16.msra.mxu0 %v560_v27 }
  0x5a   :  { %522 = vmatprep.subr.bf16.mxu0 %v640_v1 }
  0x5d   :  { %523 = vmatpush3.bf16.msra.mxu0 %v561_v28 }
  0x5e   :  { %524 = vmatprep.subr.bf16.mxu0 %v640_v1 }
  0x61   :  { %525 = vmatpush3.bf16.msra.mxu0 %v562_v36 }
  0x62   :  { %526 = vmatprep.subr.bf16.mxu0 %v640_v1 }
  0x65   :  { %527 = vmatpush3.bf16.msra.mxu0 %v563_v37 }
 0x11b   :  { %v157_v29 = vpop.f32.mrb[0].mxu0 }
 0x11c   :  { %v490_v30 = vpop.f32.mrb[1].mxu0  ;;  %v164_v32 = vmax.f32 %v157_v29, 0.0 }
 0x11d   :  { %v160_v31 = vpop.f32.mrb[2].mxu0 }
 0x11e   :  { %v165_v33 = vmax.f32 %v160_v31, 0.0  ;;  %v491_v34 = vpop.f32.mrb[3].mxu0 }
 0x120   :  { %v166_v35 = vpack.c.bf16 %v165_v33, %v164_v32 }
 0x122   :  { %509 = vmatmul.mubr.bf16.vlgmr.msra.gmra.mrb[0].mxu1 %v166_v35 }
 0x1f5   :  { %v266_v38 = vpop.f32.mrb[0].mxu1 }
 0x1f6   :  { %v510_v39 = vpop.f32.mrb[1].mxu1  ;;  %v273_v41 = vmax.f32 %v266_v38, 0.0 }
 0x1f7   :  { %v269_v40 = vpop.f32.mrb[2].mxu1 }
 0x1f8   :  { %v274_v42 = vmax.f32 %v269_v40, 0.0  ;;  %v511_v43 = vpop.f32.mrb[3].mxu1 }
 0x1fa   :  { %v275_v44 = vpack.c.bf16 %v274_v42, %v273_v41 }
 0x1fc   :  { %529 = vmatmul.mubr.bf16.vlgmr.msra.gmra.mrb[4].mxu0 %v275_v44 }
 0x2cf   :  { %v375_v45 = vpop.f32.mrb[4].mxu0 }
 0x2d0   :  { %v530_v46 = vpop.f32.mrb[5].mxu0 }
 0x2d1   :  { %v378_v47 = vpop.f32.mrb[6].mxu0 }
 0x2d2   :  { %v443_v48 = vpack.c.bf16 %v378_v47, %v375_v45  ;;  %v531_v49 = vpop.f32.mrb[7].mxu0 }
 0x2d4   :  { %444 = vst [vmem:[#allocation8] sm:$0xff] %v443_v48  }
 0x2d5   :  { %619 = shalt.err (!%p616_p6)
}
 0x2d6   :  { %s620_s10 = scalar_lea.hbm %s736_s2, 128 }
 0x2d7   :  { %p621_p7 = scmp.ne.s32.totalorder %s736_s2, %s620_s10  ;;  %p624_p8 = scmp.lt.u32.totalorder %s620_s10, %s736_s2 }
 0x2d9   :  { %p626_p9 = pnand %p624_p8, %p621_p7 }
 0x2db   :  { %629 = shalt.err (!%p626_p9)
}
 0x2dc   :  { %403 = dma.vmem_to_hbm [thread:$0]  %s398_s6, 128, %s736_s2, [#allocation5], %s637_s19, %s637_s19, %s638_s20  }
 0x2dd   :  { %634 = dma.done.wait [#allocation5], 128  }
 0x2de   :  { %635 = vsyncadd [#allocation5], 4294967168 }
 0x2df   :  { %407 = vsyncpa [#allocation4], 1 }
 0x2e0   :  { %408 = vsyncpa [#allocation7], 1 }
 0x2e1   :  { %409 = vsyncpa [#allocation5], 1 }

</bundles_post_ra>
